<compile_context>
chip_gen: v5e
topology: v5e:2x2
jax: 0.10.0
libtpu: 0.0.40
codegen_flags: <defaults>
</compile_context>

<pallas_src>
import functools

import jax
import jax.numpy as jnp
from jax.experimental import pallas as pl
from jax.experimental.pallas import tpu as pltpu

BN_EPS = 1e-5
SOFTPLUS_THRESHOLD = 20.0      # torch.nn.Softplus default
FEAT5 = 256                    # width of the last encoder layer (fixed in module)
HEAD_WIDTH = 128               # lane-dense padded width of the fused mu|var head


def _round_up(n, m):
    return ((n + m - 1) // m) * m


def _bn_relu(h, gamma, beta):
    """Training-mode BatchNorm1d (+affine) folded to scale/shift, then ReLU.

    Batch statistics (biased variance, eps=1e-5) computed in ONE pass over the
    activation (sum and sum-of-squares), all in f32.
    """
    inv_n = 1.0 / h.shape[0]
    mean = jnp.sum(h, axis=0, keepdims=True) * inv_n                 # [1, F]
    var = jnp.sum(h * h, axis=0, keepdims=True) * inv_n - mean * mean
    var = jnp.maximum(var, 0.0)                                      # guard cancellation
    s = gamma * jax.lax.rsqrt(var + BN_EPS)                          # [1, F]
    t = beta - mean * s                                              # [1, F]
    return jnp.maximum(h * s + t, 0.0)


def encoder_kernel(x_ref, wlo_ref, whi_ref, vec_ref, out_ref, *,
                   in_pad, hidden_dim, z_dim):
    H = hidden_dim
    hw = out_ref.shape[1]                     # lane-dense head width (128)

    # Layer 1: Linear(in -> H) -> BN -> ReLU   (Linear bias cancelled by BN).
    h = jnp.dot(x_ref[...].astype(jnp.bfloat16), wlo_ref[0:in_pad, :],
                preferred_element_type=jnp.float32)
    h = _bn_relu(h, vec_ref[0:1, 0:H], vec_ref[4:5, 0:H])

    # Layers 2..4: Linear(H -> H) -> BN -> ReLU (weights stacked along rows).
    for li in range(3):
        w = wlo_ref[in_pad + li * H:in_pad + (li + 1) * H, :]
        h = jnp.dot(h.astype(jnp.bfloat16), w, preferred_element_type=jnp.float32)
        h = _bn_relu(h, vec_ref[1 + li:2 + li, 0:H], vec_ref[5 + li:6 + li, 0:H])

    # Layer 5: Linear(H -> 256) -> BN -> ReLU.
    h = jnp.dot(h.astype(jnp.bfloat16), whi_ref[0:H, :],
                preferred_element_type=jnp.float32)
    h = _bn_relu(h, vec_ref[8:9, :], vec_ref[9:10, :])

    # Fused mu|var head: one bf16 matmul into a lane-dense [B, 128] slab + bias.
    head = jnp.dot(h.astype(jnp.bfloat16), whi_ref[H:H + FEAT5, 0:hw],
                   preferred_element_type=jnp.float32) + vec_ref[10:11, 0:hw]

    # Softplus (torch threshold=20) applied only to the var lanes [z, 2z).
    sp = jnp.where(head > SOFTPLUS_THRESHOLD, head,
                   jnp.log1p(jnp.exp(jnp.minimum(head, SOFTPLUS_THRESHOLD))))
    lane = jax.lax.broadcasted_iota(jnp.int32, head.shape, 1)
    is_var = jnp.logical_and(lane >= z_dim, lane < 2 * z_dim)
    out_ref[...] = jnp.where(is_var, sp, head).astype(out_ref.dtype)


def make_raw_params(key, in_dim, hidden_dim, z_dim, dtype=jnp.float32):
    """PyTorch-equivalent parameters; weights stored as [F_in, F_out]."""
    dims = [in_dim, hidden_dim, hidden_dim, hidden_dim, hidden_dim, FEAT5]
    keys = iter(jax.random.split(key, 32))
    raw = {}
    for li in range(5):
        fin, fout = dims[li], dims[li + 1]
        raw[f"w{li+1}"] = jax.random.normal(next(keys), (fin, fout), dtype) * 0.1
        raw[f"b{li+1}"] = jax.random.normal(next(keys), (fout,), dtype) * 0.01
        raw[f"g{li+1}"] = 1.0 + 0.1 * jax.random.normal(next(keys), (fout,), dtype)
        raw[f"be{li+1}"] = 0.1 * jax.random.normal(next(keys), (fout,), dtype)
    raw["wmu"] = jax.random.normal(next(keys), (FEAT5, z_dim), dtype) * 0.1
    raw["bmu"] = jax.random.normal(next(keys), (z_dim,), dtype) * 0.01
    raw["wvar"] = jax.random.normal(next(keys), (FEAT5, z_dim), dtype) * 0.1
    raw["bvar"] = jax.random.normal(next(keys), (z_dim,), dtype) * 0.01
    return raw


def pack_params(raw, in_dim, hidden_dim, z_dim):
    """Pack the 24 PyTorch tensors into 3 kernel inputs (4 DMAs incl. x).

    NOTE: the hidden-layer Linear biases (b1..b5) are intentionally dropped;
    the cancellation by the BN mean subtraction is exact ONLY for
    training-mode (batch-statistics) BatchNorm, which is what this kernel
    implements.
    """
    H = hidden_dim
    assert H % 8 == 0 and H <= FEAT5, "hidden_dim must be a multiple of 8, <= 256"
    assert 2 * z_dim <= HEAD_WIDTH
    in_pad = _round_up(in_dim, 8)

    # w_lo [in_pad + 3H, H] bf16 : layer-1..4 weights stacked along rows.
    w1p = jnp.zeros((in_pad, H), jnp.float32).at[0:in_dim, :].set(raw["w1"])
    w_lo = jnp.concatenate([w1p, raw["w2"], raw["w3"], raw["w4"]],
                           axis=0).astype(jnp.bfloat16)

    # w_hi [H + 256, 256] bf16 : layer-5 weight on top of the fused head weight
    # (mu -> lanes [0:z), var -> lanes [z:2z), rest zero; lane-padded to 256).
    w_head = jnp.zeros((FEAT5, FEAT5), jnp.float32)
    w_head = w_head.at[:, 0:z_dim].set(raw["wmu"])
    w_head = w_head.at[:, z_dim:2 * z_dim].set(raw["wvar"])
    w_hi = jnp.concatenate([raw["w5"], w_head], axis=0).astype(jnp.bfloat16)

    # vecs [11, 256] f32 : BN gamma (rows 0-3, 8) / beta (rows 4-7, 9), head bias (row 10).
    vecs = jnp.zeros((11, FEAT5), jnp.float32)
    for li in range(4):
        vecs = vecs.at[li, 0:H].set(raw[f"g{li+1}"])
        vecs = vecs.at[4 + li, 0:H].set(raw[f"be{li+1}"])
    vecs = vecs.at[8, :].set(raw["g5"])
    vecs = vecs.at[9, :].set(raw["be5"])
    b_head = jnp.zeros((HEAD_WIDTH,), jnp.float32)
    b_head = b_head.at[0:z_dim].set(raw["bmu"]).at[z_dim:2 * z_dim].set(raw["bvar"])
    vecs = vecs.at[10, 0:HEAD_WIDTH].set(b_head)

    return (w_lo, w_hi, vecs, in_pad)


def encoder_forward(x, packed, in_dim, hidden_dim, z_dim):
    B = x.shape[0]
    assert B > 1, "training-mode BatchNorm requires batch size > 1"
    # NOTE: B=8 under-fills the MXU M dimension (<7% of rows); this kernel
    # scales to B up to ~128/256 rows at essentially the same wall time.
    w_lo, w_hi, vecs, in_pad = packed
    if in_pad != in_dim:
        x = jnp.pad(x, ((0, 0), (0, in_pad - in_dim)))   # zero lanes: matmul no-op

    H = hidden_dim
    flops = 2 * B * (in_pad * H + 3 * H * H + H * FEAT5 + FEAT5 * HEAD_WIDTH)
    bytes_accessed = (x.size * x.dtype.itemsize
                      + w_lo.size * 2 + w_hi.size * 2 + vecs.size * 4
                      + B * HEAD_WIDTH * 4)
    cost = pl.CostEstimate(flops=int(flops),
                           transcendentals=int(2 * B * HEAD_WIDTH + 4 * H + FEAT5),
                           bytes_accessed=int(bytes_accessed))

    vmem = pl.BlockSpec(memory_space=pltpu.MemorySpace.VMEM)
    kernel = functools.partial(encoder_kernel, in_pad=in_pad,
                               hidden_dim=hidden_dim, z_dim=z_dim)
    out = pl.pallas_call(
        kernel,
        out_shape=jax.ShapeDtypeStruct((B, HEAD_WIDTH), x.dtype),
        in_specs=[vmem] * 4,
        out_specs=vmem,
        cost_estimate=cost,
    )(x, w_lo, w_hi, vecs)
    return out[:, 0:z_dim], out[:, z_dim:2 * z_dim]


def encoder_reference(x, raw):
    """Pure-JAX f32 reference of the original module (with the Linear biases)."""
    h = x
    for li in range(5):
        h = jnp.dot(h, raw[f"w{li+1}"], precision="highest") + raw[f"b{li+1}"]
        mean = jnp.mean(h, axis=0, keepdims=True)
        var = jnp.mean(jnp.square(h - mean), axis=0, keepdims=True)
        h = (h - mean) / jnp.sqrt(var + BN_EPS) * raw[f"g{li+1}"] + raw[f"be{li+1}"]
        h = jnp.maximum(h, 0.0)
    mu = jnp.dot(h, raw["wmu"], precision="highest") + raw["bmu"]
    v = jnp.dot(h, raw["wvar"], precision="highest") + raw["bvar"]
    return mu, jax.nn.softplus(v)


if __name__ == "__main__":
    # Small shapes consistent with the module: x is the already-concatenated
    # [inp_dim + c_bar_dim] feature vector; B > 1 needed for BatchNorm stats.
    # (hidden_dim=32 under-fills lanes; 128 would use the same vregs/MXU passes.)
    B = 8
    inp_dim, c_bar_dim, hidden_dim, z_dim = 12, 4, 32, 8
    in_dim = inp_dim + c_bar_dim

    key = jax.random.PRNGKey(0)
    kx, kp = jax.random.split(key)
    x = jax.random.normal(kx, (B, in_dim), jnp.float32)
    raw = make_raw_params(kp, in_dim, hidden_dim, z_dim)
    packed = pack_params(raw, in_dim, hidden_dim, z_dim)

    mu, var = encoder_forward(x, packed, in_dim, hidden_dim, z_dim)
    jax.block_until_ready((mu, var))

    assert mu.shape == (B, z_dim) and var.shape == (B, z_dim)
    assert bool(jnp.all(var >= 0.0))                     # softplus is non-negative
    assert bool(jnp.all(jnp.isfinite(mu))) and bool(jnp.all(jnp.isfinite(var)))

    # Compare against the full f32 reference (including the BN-cancelled biases).
    mu_ref, var_ref = encoder_reference(x, raw)
    assert bool(jnp.allclose(mu, mu_ref, atol=5e-2, rtol=5e-2))
    assert bool(jnp.allclose(var, var_ref, atol=5e-2, rtol=5e-2))

    print("KERNEL_OK")
</pallas_src>

<mosaic_0001>
module attributes {stable_mosaic.version = 11 : i64} {
  func.func @encoder_kernel(%arg0: memref<8x16xf32, #tpu.memory_space<vmem>>, %arg1: memref<112x32xbf16, #tpu.memory_space<vmem>>, %arg2: memref<288x256xbf16, #tpu.memory_space<vmem>>, %arg3: memref<11x256xf32, #tpu.memory_space<vmem>>, %arg4: memref<8x128xf32, #tpu.memory_space<vmem>>) attributes {dimension_semantics = [], scalar_prefetch = 0 : i64, scratch_operands = 0 : i64, tpu.core_type = #tpu.core_type<tc>} {
    %c0 = arith.constant 0 : index
    %c0_0 = arith.constant 0 : index
    %0 = vector.load %arg0[%c0, %c0_0] : memref<8x16xf32, #tpu.memory_space<vmem>>, vector<8x16xf32>
    %1 = arith.truncf %0 : vector<8x16xf32> to vector<8x16xbf16>
    %c0_1 = arith.constant 0 : index
    %c0_2 = arith.constant 0 : index
    %2 = vector.load %arg1[%c0_1, %c0_2] : memref<112x32xbf16, #tpu.memory_space<vmem>>, vector<16x32xbf16>
    %cst = arith.constant dense<0.000000e+00> : vector<8x32xf32>
    %3 = tpu.matmul %1, %2, %cst {dimension_numbers = #tpu.dot_dimension_numbers<[1], [0], [0], [1], [0, 0, 1, 1], [], []>} : vector<8x16xbf16>, vector<16x32xbf16>, vector<8x32xf32> -> vector<8x32xf32>
    %c0_3 = arith.constant 0 : index
    %c0_4 = arith.constant 0 : index
    %4 = vector.load %arg3[%c0_3, %c0_4] : memref<11x256xf32, #tpu.memory_space<vmem>>, vector<1x32xf32>
    %c4 = arith.constant 4 : index
    %c0_5 = arith.constant 0 : index
    %5 = vector.load %arg3[%c4, %c0_5] : memref<11x256xf32, #tpu.memory_space<vmem>>, vector<1x32xf32>
    %cst_6 = arith.constant dense<0.000000e+00> : vector<32xf32>
    %6 = vector.multi_reduction <add>, %3, %cst_6 [0] : vector<8x32xf32> to vector<32xf32>
    %7 = vector.shape_cast %6 : vector<32xf32> to vector<1x32xf32>
    %cst_7 = arith.constant 1.250000e-01 : f32
    %8 = vector.broadcast %cst_7 : f32 to vector<1x32xf32>
    %9 = arith.mulf %7, %8 : vector<1x32xf32>
    %10 = arith.mulf %3, %3 : vector<8x32xf32>
    %cst_8 = arith.constant dense<0.000000e+00> : vector<32xf32>
    %11 = vector.multi_reduction <add>, %10, %cst_8 [0] : vector<8x32xf32> to vector<32xf32>
    %12 = vector.shape_cast %11 : vector<32xf32> to vector<1x32xf32>
    %cst_9 = arith.constant 1.250000e-01 : f32
    %13 = vector.broadcast %cst_9 : f32 to vector<1x32xf32>
    %14 = arith.mulf %12, %13 : vector<1x32xf32>
    %15 = arith.mulf %9, %9 : vector<1x32xf32>
    %16 = arith.subf %14, %15 : vector<1x32xf32>
    %cst_10 = arith.constant 0.000000e+00 : f32
    %17 = vector.broadcast %cst_10 : f32 to vector<1x32xf32>
    %18 = arith.maximumf %16, %17 : vector<1x32xf32>
    %cst_11 = arith.constant 9.99999974E-6 : f32
    %19 = vector.broadcast %cst_11 : f32 to vector<1x32xf32>
    %20 = arith.addf %18, %19 : vector<1x32xf32>
    %21 = math.rsqrt %20 : vector<1x32xf32>
    %22 = arith.mulf %4, %21 : vector<1x32xf32>
    %23 = arith.mulf %9, %22 : vector<1x32xf32>
    %24 = arith.subf %5, %23 : vector<1x32xf32>
    %25 = vector.broadcast %22 : vector<1x32xf32> to vector<8x32xf32>
    %26 = arith.mulf %3, %25 : vector<8x32xf32>
    %27 = vector.broadcast %24 : vector<1x32xf32> to vector<8x32xf32>
    %28 = arith.addf %26, %27 : vector<8x32xf32>
    %cst_12 = arith.constant 0.000000e+00 : f32
    %29 = vector.broadcast %cst_12 : f32 to vector<8x32xf32>
    %30 = arith.maximumf %28, %29 : vector<8x32xf32>
    %c16 = arith.constant 16 : index
    %c0_13 = arith.constant 0 : index
    %31 = vector.load %arg1[%c16, %c0_13] : memref<112x32xbf16, #tpu.memory_space<vmem>>, vector<32x32xbf16>
    %32 = arith.truncf %30 : vector<8x32xf32> to vector<8x32xbf16>
    %cst_14 = arith.constant dense<0.000000e+00> : vector<8x32xf32>
    %33 = tpu.matmul %32, %31, %cst_14 {dimension_numbers = #tpu.dot_dimension_numbers<[1], [0], [0], [1], [0, 0, 1, 1], [], []>} : vector<8x32xbf16>, vector<32x32xbf16>, vector<8x32xf32> -> vector<8x32xf32>
    %c1 = arith.constant 1 : index
    %c0_15 = arith.constant 0 : index
    %34 = vector.load %arg3[%c1, %c0_15] : memref<11x256xf32, #tpu.memory_space<vmem>>, vector<1x32xf32>
    %c5 = arith.constant 5 : index
    %c0_16 = arith.constant 0 : index
    %35 = vector.load %arg3[%c5, %c0_16] : memref<11x256xf32, #tpu.memory_space<vmem>>, vector<1x32xf32>
    %cst_17 = arith.constant dense<0.000000e+00> : vector<32xf32>
    %36 = vector.multi_reduction <add>, %33, %cst_17 [0] : vector<8x32xf32> to vector<32xf32>
    %37 = vector.shape_cast %36 : vector<32xf32> to vector<1x32xf32>
    %cst_18 = arith.constant 1.250000e-01 : f32
    %38 = vector.broadcast %cst_18 : f32 to vector<1x32xf32>
    %39 = arith.mulf %37, %38 : vector<1x32xf32>
    %40 = arith.mulf %33, %33 : vector<8x32xf32>
    %cst_19 = arith.constant dense<0.000000e+00> : vector<32xf32>
    %41 = vector.multi_reduction <add>, %40, %cst_19 [0] : vector<8x32xf32> to vector<32xf32>
    %42 = vector.shape_cast %41 : vector<32xf32> to vector<1x32xf32>
    %cst_20 = arith.constant 1.250000e-01 : f32
    %43 = vector.broadcast %cst_20 : f32 to vector<1x32xf32>
    %44 = arith.mulf %42, %43 : vector<1x32xf32>
    %45 = arith.mulf %39, %39 : vector<1x32xf32>
    %46 = arith.subf %44, %45 : vector<1x32xf32>
    %cst_21 = arith.constant 0.000000e+00 : f32
    %47 = vector.broadcast %cst_21 : f32 to vector<1x32xf32>
    %48 = arith.maximumf %46, %47 : vector<1x32xf32>
    %cst_22 = arith.constant 9.99999974E-6 : f32
    %49 = vector.broadcast %cst_22 : f32 to vector<1x32xf32>
    %50 = arith.addf %48, %49 : vector<1x32xf32>
    %51 = math.rsqrt %50 : vector<1x32xf32>
    %52 = arith.mulf %34, %51 : vector<1x32xf32>
    %53 = arith.mulf %39, %52 : vector<1x32xf32>
    %54 = arith.subf %35, %53 : vector<1x32xf32>
    %55 = vector.broadcast %52 : vector<1x32xf32> to vector<8x32xf32>
    %56 = arith.mulf %33, %55 : vector<8x32xf32>
    %57 = vector.broadcast %54 : vector<1x32xf32> to vector<8x32xf32>
    %58 = arith.addf %56, %57 : vector<8x32xf32>
    %cst_23 = arith.constant 0.000000e+00 : f32
    %59 = vector.broadcast %cst_23 : f32 to vector<8x32xf32>
    %60 = arith.maximumf %58, %59 : vector<8x32xf32>
    %c48 = arith.constant 48 : index
    %c0_24 = arith.constant 0 : index
    %61 = vector.load %arg1[%c48, %c0_24] : memref<112x32xbf16, #tpu.memory_space<vmem>>, vector<32x32xbf16>
    %62 = arith.truncf %60 : vector<8x32xf32> to vector<8x32xbf16>
    %cst_25 = arith.constant dense<0.000000e+00> : vector<8x32xf32>
    %63 = tpu.matmul %62, %61, %cst_25 {dimension_numbers = #tpu.dot_dimension_numbers<[1], [0], [0], [1], [0, 0, 1, 1], [], []>} : vector<8x32xbf16>, vector<32x32xbf16>, vector<8x32xf32> -> vector<8x32xf32>
    %c2 = arith.constant 2 : index
    %c0_26 = arith.constant 0 : index
    %64 = vector.load %arg3[%c2, %c0_26] : memref<11x256xf32, #tpu.memory_space<vmem>>, vector<1x32xf32>
    %c6 = arith.constant 6 : index
    %c0_27 = arith.constant 0 : index
    %65 = vector.load %arg3[%c6, %c0_27] : memref<11x256xf32, #tpu.memory_space<vmem>>, vector<1x32xf32>
    %cst_28 = arith.constant dense<0.000000e+00> : vector<32xf32>
    %66 = vector.multi_reduction <add>, %63, %cst_28 [0] : vector<8x32xf32> to vector<32xf32>
    %67 = vector.shape_cast %66 : vector<32xf32> to vector<1x32xf32>
    %cst_29 = arith.constant 1.250000e-01 : f32
    %68 = vector.broadcast %cst_29 : f32 to vector<1x32xf32>
    %69 = arith.mulf %67, %68 : vector<1x32xf32>
    %70 = arith.mulf %63, %63 : vector<8x32xf32>
    %cst_30 = arith.constant dense<0.000000e+00> : vector<32xf32>
    %71 = vector.multi_reduction <add>, %70, %cst_30 [0] : vector<8x32xf32> to vector<32xf32>
    %72 = vector.shape_cast %71 : vector<32xf32> to vector<1x32xf32>
    %cst_31 = arith.constant 1.250000e-01 : f32
    %73 = vector.broadcast %cst_31 : f32 to vector<1x32xf32>
    %74 = arith.mulf %72, %73 : vector<1x32xf32>
    %75 = arith.mulf %69, %69 : vector<1x32xf32>
    %76 = arith.subf %74, %75 : vector<1x32xf32>
    %cst_32 = arith.constant 0.000000e+00 : f32
    %77 = vector.broadcast %cst_32 : f32 to vector<1x32xf32>
    %78 = arith.maximumf %76, %77 : vector<1x32xf32>
    %cst_33 = arith.constant 9.99999974E-6 : f32
    %79 = vector.broadcast %cst_33 : f32 to vector<1x32xf32>
    %80 = arith.addf %78, %79 : vector<1x32xf32>
    %81 = math.rsqrt %80 : vector<1x32xf32>
    %82 = arith.mulf %64, %81 : vector<1x32xf32>
    %83 = arith.mulf %69, %82 : vector<1x32xf32>
    %84 = arith.subf %65, %83 : vector<1x32xf32>
    %85 = vector.broadcast %82 : vector<1x32xf32> to vector<8x32xf32>
    %86 = arith.mulf %63, %85 : vector<8x32xf32>
    %87 = vector.broadcast %84 : vector<1x32xf32> to vector<8x32xf32>
    %88 = arith.addf %86, %87 : vector<8x32xf32>
    %cst_34 = arith.constant 0.000000e+00 : f32
    %89 = vector.broadcast %cst_34 : f32 to vector<8x32xf32>
    %90 = arith.maximumf %88, %89 : vector<8x32xf32>
    %c80 = arith.constant 80 : index
    %c0_35 = arith.constant 0 : index
    %91 = vector.load %arg1[%c80, %c0_35] : memref<112x32xbf16, #tpu.memory_space<vmem>>, vector<32x32xbf16>
    %92 = arith.truncf %90 : vector<8x32xf32> to vector<8x32xbf16>
    %cst_36 = arith.constant dense<0.000000e+00> : vector<8x32xf32>
    %93 = tpu.matmul %92, %91, %cst_36 {dimension_numbers = #tpu.dot_dimension_numbers<[1], [0], [0], [1], [0, 0, 1, 1], [], []>} : vector<8x32xbf16>, vector<32x32xbf16>, vector<8x32xf32> -> vector<8x32xf32>
    %c3 = arith.constant 3 : index
    %c0_37 = arith.constant 0 : index
    %94 = vector.load %arg3[%c3, %c0_37] : memref<11x256xf32, #tpu.memory_space<vmem>>, vector<1x32xf32>
    %c7 = arith.constant 7 : index
    %c0_38 = arith.constant 0 : index
    %95 = vector.load %arg3[%c7, %c0_38] : memref<11x256xf32, #tpu.memory_space<vmem>>, vector<1x32xf32>
    %cst_39 = arith.constant dense<0.000000e+00> : vector<32xf32>
    %96 = vector.multi_reduction <add>, %93, %cst_39 [0] : vector<8x32xf32> to vector<32xf32>
    %97 = vector.shape_cast %96 : vector<32xf32> to vector<1x32xf32>
    %cst_40 = arith.constant 1.250000e-01 : f32
    %98 = vector.broadcast %cst_40 : f32 to vector<1x32xf32>
    %99 = arith.mulf %97, %98 : vector<1x32xf32>
    %100 = arith.mulf %93, %93 : vector<8x32xf32>
    %cst_41 = arith.constant dense<0.000000e+00> : vector<32xf32>
    %101 = vector.multi_reduction <add>, %100, %cst_41 [0] : vector<8x32xf32> to vector<32xf32>
    %102 = vector.shape_cast %101 : vector<32xf32> to vector<1x32xf32>
    %cst_42 = arith.constant 1.250000e-01 : f32
    %103 = vector.broadcast %cst_42 : f32 to vector<1x32xf32>
    %104 = arith.mulf %102, %103 : vector<1x32xf32>
    %105 = arith.mulf %99, %99 : vector<1x32xf32>
    %106 = arith.subf %104, %105 : vector<1x32xf32>
    %cst_43 = arith.constant 0.000000e+00 : f32
    %107 = vector.broadcast %cst_43 : f32 to vector<1x32xf32>
    %108 = arith.maximumf %106, %107 : vector<1x32xf32>
    %cst_44 = arith.constant 9.99999974E-6 : f32
    %109 = vector.broadcast %cst_44 : f32 to vector<1x32xf32>
    %110 = arith.addf %108, %109 : vector<1x32xf32>
    %111 = math.rsqrt %110 : vector<1x32xf32>
    %112 = arith.mulf %94, %111 : vector<1x32xf32>
    %113 = arith.mulf %99, %112 : vector<1x32xf32>
    %114 = arith.subf %95, %113 : vector<1x32xf32>
    %115 = vector.broadcast %112 : vector<1x32xf32> to vector<8x32xf32>
    %116 = arith.mulf %93, %115 : vector<8x32xf32>
    %117 = vector.broadcast %114 : vector<1x32xf32> to vector<8x32xf32>
    %118 = arith.addf %116, %117 : vector<8x32xf32>
    %cst_45 = arith.constant 0.000000e+00 : f32
    %119 = vector.broadcast %cst_45 : f32 to vector<8x32xf32>
    %120 = arith.maximumf %118, %119 : vector<8x32xf32>
    %121 = arith.truncf %120 : vector<8x32xf32> to vector<8x32xbf16>
    %c0_46 = arith.constant 0 : index
    %c0_47 = arith.constant 0 : index
    %122 = vector.load %arg2[%c0_46, %c0_47] : memref<288x256xbf16, #tpu.memory_space<vmem>>, vector<32x256xbf16>
    %cst_48 = arith.constant dense<0.000000e+00> : vector<8x256xf32>
    %123 = tpu.matmul %121, %122, %cst_48 {dimension_numbers = #tpu.dot_dimension_numbers<[1], [0], [0], [1], [0, 0, 1, 1], [], []>} : vector<8x32xbf16>, vector<32x256xbf16>, vector<8x256xf32> -> vector<8x256xf32>
    %c8 = arith.constant 8 : index
    %c0_49 = arith.constant 0 : index
    %124 = vector.load %arg3[%c8, %c0_49] : memref<11x256xf32, #tpu.memory_space<vmem>>, vector<1x256xf32>
    %c9 = arith.constant 9 : index
    %c0_50 = arith.constant 0 : index
    %125 = vector.load %arg3[%c9, %c0_50] : memref<11x256xf32, #tpu.memory_space<vmem>>, vector<1x256xf32>
    %cst_51 = arith.constant dense<0.000000e+00> : vector<256xf32>
    %126 = vector.multi_reduction <add>, %123, %cst_51 [0] : vector<8x256xf32> to vector<256xf32>
    %127 = vector.shape_cast %126 : vector<256xf32> to vector<1x256xf32>
    %cst_52 = arith.constant 1.250000e-01 : f32
    %128 = vector.broadcast %cst_52 : f32 to vector<1x256xf32>
    %129 = arith.mulf %127, %128 : vector<1x256xf32>
    %130 = arith.mulf %123, %123 : vector<8x256xf32>
    %cst_53 = arith.constant dense<0.000000e+00> : vector<256xf32>
    %131 = vector.multi_reduction <add>, %130, %cst_53 [0] : vector<8x256xf32> to vector<256xf32>
    %132 = vector.shape_cast %131 : vector<256xf32> to vector<1x256xf32>
    %cst_54 = arith.constant 1.250000e-01 : f32
    %133 = vector.broadcast %cst_54 : f32 to vector<1x256xf32>
    %134 = arith.mulf %132, %133 : vector<1x256xf32>
    %135 = arith.mulf %129, %129 : vector<1x256xf32>
    %136 = arith.subf %134, %135 : vector<1x256xf32>
    %cst_55 = arith.constant 0.000000e+00 : f32
    %137 = vector.broadcast %cst_55 : f32 to vector<1x256xf32>
    %138 = arith.maximumf %136, %137 : vector<1x256xf32>
    %cst_56 = arith.constant 9.99999974E-6 : f32
    %139 = vector.broadcast %cst_56 : f32 to vector<1x256xf32>
    %140 = arith.addf %138, %139 : vector<1x256xf32>
    %141 = math.rsqrt %140 : vector<1x256xf32>
    %142 = arith.mulf %124, %141 : vector<1x256xf32>
    %143 = arith.mulf %129, %142 : vector<1x256xf32>
    %144 = arith.subf %125, %143 : vector<1x256xf32>
    %145 = vector.broadcast %142 : vector<1x256xf32> to vector<8x256xf32>
    %146 = arith.mulf %123, %145 : vector<8x256xf32>
    %147 = vector.broadcast %144 : vector<1x256xf32> to vector<8x256xf32>
    %148 = arith.addf %146, %147 : vector<8x256xf32>
    %cst_57 = arith.constant 0.000000e+00 : f32
    %149 = vector.broadcast %cst_57 : f32 to vector<8x256xf32>
    %150 = arith.maximumf %148, %149 : vector<8x256xf32>
    %151 = arith.truncf %150 : vector<8x256xf32> to vector<8x256xbf16>
    %c32 = arith.constant 32 : index
    %c0_58 = arith.constant 0 : index
    %152 = vector.load %arg2[%c32, %c0_58] : memref<288x256xbf16, #tpu.memory_space<vmem>>, vector<256x128xbf16>
    %cst_59 = arith.constant dense<0.000000e+00> : vector<8x128xf32>
    %153 = tpu.matmul %151, %152, %cst_59 {dimension_numbers = #tpu.dot_dimension_numbers<[1], [0], [0], [1], [0, 0, 1, 1], [], []>} : vector<8x256xbf16>, vector<256x128xbf16>, vector<8x128xf32> -> vector<8x128xf32>
    %c10 = arith.constant 10 : index
    %c0_60 = arith.constant 0 : index
    %154 = vector.load %arg3[%c10, %c0_60] : memref<11x256xf32, #tpu.memory_space<vmem>>, vector<1x128xf32>
    %155 = vector.broadcast %154 : vector<1x128xf32> to vector<8x128xf32>
    %156 = arith.addf %153, %155 : vector<8x128xf32>
    %cst_61 = arith.constant 2.000000e+01 : f32
    %157 = vector.broadcast %cst_61 : f32 to vector<8x128xf32>
    %158 = arith.cmpf ogt, %156, %157 : vector<8x128xf32>
    %cst_62 = arith.constant 2.000000e+01 : f32
    %159 = vector.broadcast %cst_62 : f32 to vector<8x128xf32>
    %160 = arith.minimumf %156, %159 : vector<8x128xf32>
    %161 = math.exp %160 : vector<8x128xf32>
    %162 = math.log1p %161 : vector<8x128xf32>
    %163 = arith.select %158, %156, %162 : vector<8x128xi1>, vector<8x128xf32>
    %164 = tpu.iota {dimensions = array<i32: 1>} : vector<8x128xi32>
    %c8_i32 = arith.constant 8 : i32
    %165 = vector.broadcast %c8_i32 : i32 to vector<8x128xi32>
    %166 = arith.cmpi sge, %164, %165 : vector<8x128xi32>
    %c16_i32 = arith.constant 16 : i32
    %167 = vector.broadcast %c16_i32 : i32 to vector<8x128xi32>
    %168 = arith.cmpi slt, %164, %167 : vector<8x128xi32>
    %169 = arith.andi %166, %168 : vector<8x128xi1>
    %170 = arith.select %169, %163, %156 : vector<8x128xi1>, vector<8x128xf32>
    %c0_63 = arith.constant 0 : index
    %c0_64 = arith.constant 0 : index
    %171 = vector.load %arg4[%c0_63, %c0_64] : memref<8x128xf32, #tpu.memory_space<vmem>>, vector<8x128xf32>
    tpu.vector_store %arg4[%c0_63, %c0_64], %170 {strides = array<i32>} : memref<8x128xf32, #tpu.memory_space<vmem>>, vector<8x128xf32>,
    return
  }
}

</mosaic_0001>

<bundles_post_ra>
// kernel: tpu_custom_call.1
= control target key start
LH: loop header
LB: loop body
LE: loop exit
PB: predicated region body
PF: predicated region fallthrough
CT: control target
= control target key end

     0   :  { %9 = vsyncpa [#allocation3], 0  ;;  %s1004_s0 = inlined_call_operand.vmem [shape: f32[8,16], index: 0, kind: input, shape index: {}]   ;;  %s1005_s1 = inlined_call_operand.vmem [shape: bf16[112,32], index: 1, kind: input, shape index: {}]   ;;  %s1006_s2 = inlined_call_operand.hbm [shape: bf16[288,256], index: 2, kind: input, shape index: {}]   ;;  %s1007_s3 = inlined_call_operand.vmem [shape: f32[11,256], index: 3, kind: input, shape index: {}]   ;;  %s1008_s4 = inlined_call_operand.hbm [shape: f32[8,128], index: 4, kind: output, shape index: {}]  }
   0x1   :  { %10 = vsyncpa [#allocation4], 0  ;;  %s19_s17 = sshll.u32 %s1006_s2, 4  ;;  %s875_s18 = smov [#allocation2]   ;;  %s20_s17 = int_to_ptr.hbm [resolvable:$true] %s19_s17 }
   0x2   :  { %s21_s19 = sshll.u32 %s875_s18, 4  ;;  %s876_s20 = smov 128   ;;  %s22_s19 = int_to_ptr.vmem [resolvable:$true] %s21_s19 }
   0x3   :  { %s877_s21 = smov 8  }
   0x4   :  { %27 = dma.hbm_to_vmem [thread:$0]  %s20_s17, 4608, %s22_s19, [#allocation3], %s876_s20, %s876_s20, %s877_s21  }
   0x5   :  { %871 = dma.done.wait [#allocation3], 4608  }
   0x6   :  { %872 = vsyncadd [#allocation3], 4294962688  ;;  %v776_v0 = vld [vmem:[%s1005_s1] sm:$0xff]  ;;  %vm45_vm0 = vcmask 130048   ;;  %vm64_vm1 = vcmask 261120   ;;  %v778_v19 = vld [vmem:[%s1005_s1 + $0x10] sm:$0xff] }
   0x7   :  { %v35_v1 = vld [vmem:[%s1004_s0] sm:$0xff]  ;;  %56 = vmatpush.bf16.msra.mxu0 %v776_v0  ;;  %128 = vmatpush.bf16.msra.mxu1 %v778_v19  ;;  %v777_v22 = vld [vmem:[%s1005_s1 + $0x8] sm:$0xff]  ;;  %s650_s6 = sshll.u32 %s1008_s4, 4  ;;  %s651_s6 = int_to_ptr.hbm [resolvable:$true] %s650_s6 }
   0x8   :  { %v36_v2 = vpack.c.bf16 %v35_v1, %v35_v1  ;;  %v62_v33 = vld [vmem:[%s1007_s3] ss:$0 sm:$0xff]  ;;  %v63_v37 = vld [vmem:[%s1007_s3 + $0x4] ss:$0 sm:$0xff]  ;;  %v779_v1 = vld [vmem:[%s1005_s1 + $0x18] sm:$0xff] }
   0x9   :  { %v780_v60 = vld [vmem:[%s1005_s1 + $0x20] sm:$0xff] }
   0xa   :  { %664 = vmatmul.msk.bf16.vlgmr.msra.gmra.mxu0 %vm45_vm0, %v36_v2 }
   0xb   :  { %129 = vmatpush.bf16.msra.mxu1 %v777_v22  ;;  %200 = vmatpush.bf16.msrb.mxu0 %v780_v60 }
   0xf   :  { %201 = vmatpush.bf16.msrb.mxu0 %v779_v1 }
  0x87   :  { %v58_v3 = vpop.f32.mrf.mxu0 }
  0x88   :  { %v65_v4 = vsel %vm64_vm1, %v58_v3, 0.0  ;;  %v73_v5 = vmul.f32 %v58_v3, %v58_v3 }
  0x89   :  { %v66_v6 = vrot.slane %v65_v4, 4 }
  0x8a   :  { %v74_v7 = vsel %vm64_vm1, %v73_v5, 0.0 }
  0x8b   :  { %v67_v8 = vadd.f32 %v66_v6, %v65_v4  ;;  %v75_v9 = vrot.slane %v74_v7, 4 }
  0x8d   :  { %v68_v10 = vrot.slane %v67_v8, 2  ;;  %v76_v11 = vadd.f32 %v75_v9, %v74_v7 }
  0x8f   :  { %v69_v12 = vadd.f32 %v68_v10, %v67_v8  ;;  %v77_v13 = vrot.slane %v76_v11, 2  ;;  %v60_v14 = vpop.f32.mrf.mxu0  ;;  %v135_v10 = vld [vmem:[%s1007_s3 + $0x1] ss:$0 sm:$0xff] }
  0x90   :  { %v136_v14 = vld [vmem:[%s1007_s3 + $0x5] ss:$0 sm:$0xff] }
  0x91   :  { %v70_v15 = vrot.slane %v69_v12, 1  ;;  %v78_v16 = vadd.f32 %v77_v13, %v76_v11 }
  0x93   :  { %v71_v17 = vadd.f32 %v70_v15, %v69_v12  ;;  %v79_v18 = vrot.slane %v78_v16, 1 }
  0x95   :  { %v72_v20 = vmul.f32 0.125, %v71_v17  ;;  %v80_v21 = vadd.f32 %v79_v18, %v78_v16 }
  0x97   :  { %v81_v23 = vmul.f32 0.125, %v80_v21  ;;  %v82_v24 = vmul.f32 %v72_v20, %v72_v20 }
  0x99   :  { %v83_v25 = vsub.f32 %v81_v23, %v82_v24 }
  0x9b   :  { %v84_v26 = vmax.f32 %v83_v25, 0.0 }
  0x9d   :  { %v85_v27 = vadd.f32 1e-05, %v84_v26 }
  0x9f   :  { %807 = vrsqrt.f32 %v85_v27  ;;  %vm92_vm3 = vweird.f32 %v85_v27 }
  0xa5   :  { %v808_v28 = vpop.eup %807 }
  0xa6   :  { %v87_v29 = vmul.f32 %v808_v28, %v85_v27  ;;  %vm93_vm2 = vweird.f32 %v808_v28 }
  0xa7   :  { %vm94_vm4 = vmor %vm92_vm3, %vm93_vm2  ;;  %vm437_vm3 = vcmask 1040384  }
  0xa8   :  { %v88_v30 = vmul.f32 %v808_v28, %v87_v29 }
  0xaa   :  { %v89_v31 = vmul.f32 0.5, %v88_v30 }
  0xac   :  { %v90_v32 = vsub.f32 1.5, %v89_v31 }
  0xae   :  { %v91_v34 = vmul.f32 %v808_v28, %v90_v32 }
  0xb0   :  { %v95_v35 = vsel %vm94_vm4, %v808_v28, %v91_v34 }
  0xb1   :  { %v96_v36 = vmul.f32 %v95_v35, %v62_v33 }
  0xb3   :  { %v97_v38 = vmul.f32 %v96_v36, %v72_v20  ;;  %v99_v39 = vmul.f32 %v96_v36, %v58_v3 }
  0xb5   :  { %v98_v40 = vsub.f32 %v63_v37, %v97_v38  ;;  %v782_v37 = vld [vmem:[%s1005_s1 + $0x30] sm:$0xff] }
  0xb6   :  { %272 = vmatpush.bf16.msra.mxu3 %v782_v37 }
  0xb7   :  { %v100_v41 = vadd.f32 %v99_v39, %v98_v40  ;;  %v781_v40 = vld [vmem:[%s1005_s1 + $0x28] sm:$0xff] }
  0xb9   :  { %v101_v42 = vmax.f32 %v100_v41, 0.0 }
  0xba   :  { %273 = vmatpush.bf16.msra.mxu3 %v781_v40 }
  0xbb   :  { %v106_v43 = vpack.c.bf16 %v101_v42, %v101_v42 }
  0xbd   :  { %673 = vmatmul.msk.bf16.vlgmr.msra.gmra.mxu1 %vm64_vm1, %v106_v43 }
 0x13a   :  { %v131_v44 = vpop.f32.mrf.mxu1 }
 0x13b   :  { %v137_v45 = vsel %vm64_vm1, %v131_v44, 0.0  ;;  %v145_v46 = vmul.f32 %v131_v44, %v131_v44 }
 0x13c   :  { %v138_v47 = vrot.slane %v137_v45, 4 }
 0x13d   :  { %v146_v48 = vsel %vm64_vm1, %v145_v46, 0.0 }
 0x13e   :  { %v139_v49 = vadd.f32 %v138_v47, %v137_v45  ;;  %v147_v50 = vrot.slane %v146_v48, 4 }
 0x140   :  { %v140_v51 = vrot.slane %v139_v49, 2  ;;  %v148_v52 = vadd.f32 %v147_v50, %v146_v48 }
 0x142   :  { %v141_v53 = vadd.f32 %v140_v51, %v139_v49  ;;  %v149_v54 = vrot.slane %v148_v52, 2  ;;  %v133_v55 = vpop.f32.mrf.mxu1  ;;  %v207_v51 = vld [vmem:[%s1007_s3 + $0x2] ss:$0 sm:$0xff] }
 0x143   :  { %v208_v55 = vld [vmem:[%s1007_s3 + $0x6] ss:$0 sm:$0xff] }
 0x144   :  { %v142_v56 = vrot.slane %v141_v53, 1  ;;  %v150_v57 = vadd.f32 %v149_v54, %v148_v52 }
 0x146   :  { %v143_v58 = vadd.f32 %v142_v56, %v141_v53  ;;  %v151_v59 = vrot.slane %v150_v57, 1 }
 0x148   :  { %v144_v61 = vmul.f32 0.125, %v143_v58  ;;  %v152_v62 = vadd.f32 %v151_v59, %v150_v57 }
 0x14a   :  { %v153_v63 = vmul.f32 0.125, %v152_v62  ;;  %v154_v0 = vmul.f32 %v144_v61, %v144_v61 }
 0x14c   :  { %v155_v2 = vsub.f32 %v153_v63, %v154_v0 }
 0x14e   :  { %v156_v3 = vmax.f32 %v155_v2, 0.0 }
 0x150   :  { %v157_v4 = vadd.f32 1e-05, %v156_v3 }
 0x152   :  { %809 = vrsqrt.f32 %v157_v4  ;;  %vm164_vm6 = vweird.f32 %v157_v4 }
 0x158   :  { %v810_v5 = vpop.eup %809 }
 0x159   :  { %v159_v6 = vmul.f32 %v810_v5, %v157_v4  ;;  %vm165_vm5 = vweird.f32 %v810_v5 }
 0x15a   :  { %vm166_vm7 = vmor %vm164_vm6, %vm165_vm5 }
 0x15b   :  { %v160_v7 = vmul.f32 %v810_v5, %v159_v6 }
 0x15d   :  { %v161_v8 = vmul.f32 0.5, %v160_v7 }
 0x15f   :  { %v162_v9 = vsub.f32 1.5, %v161_v8 }
 0x161   :  { %v163_v11 = vmul.f32 %v810_v5, %v162_v9 }
 0x163   :  { %v167_v12 = vsel %vm166_vm7, %v810_v5, %v163_v11 }
 0x164   :  { %v168_v13 = vmul.f32 %v167_v12, %v135_v10 }
 0x166   :  { %v169_v15 = vmul.f32 %v168_v13, %v144_v61  ;;  %v171_v17 = vmul.f32 %v168_v13, %v131_v44 }
 0x168   :  { %v170_v16 = vsub.f32 %v136_v14, %v169_v15  ;;  %v785_v14 = vld [vmem:[#allocation2 + $0x14] sm:$0xf]  ;;  %v704_v15 = vld [vmem:[#allocation2 + $0x18] sm:$0xf0] }
 0x16a   :  { %v172_v18 = vadd.f32 %v171_v17, %v170_v16  ;;  %v707_v16 = vor.u32 %v785_v14, %v704_v15  ;;  %v702_v17 = vld [vmem:[#allocation2 + $0x10] sm:$0xf] }
 0x16c   :  { %v173_v19 = vmax.f32 %v172_v18, 0.0  ;;  %v786_v18 = vld [vmem:[#allocation2 + $0x14] sm:$0xf0]  ;;  %365 = vmatpush.bf16.msrb.mxu1 %v707_v16 }
 0x16e   :  { %v178_v20 = vpack.c.bf16 %v173_v19, %v173_v19 }
 0x170   :  { %682 = vmatmul.msk.bf16.vlgmr.msrb.gmra.mxu0 %vm64_vm1, %v178_v20 }
 0x1ed   :  { %v203_v21 = vpop.f32.mrf.mxu0 }
 0x1ee   :  { %v209_v22 = vsel %vm64_vm1, %v203_v21, 0.0  ;;  %v217_v23 = vmul.f32 %v203_v21, %v203_v21 }
 0x1ef   :  { %v210_v24 = vrot.slane %v209_v22, 4 }
 0x1f0   :  { %v218_v25 = vsel %vm64_vm1, %v217_v23, 0.0 }
 0x1f1   :  { %v211_v26 = vadd.f32 %v210_v24, %v209_v22  ;;  %v219_v27 = vrot.slane %v218_v25, 4  ;;  %v783_v24 = vld [vmem:[#allocation2 + $0x4] sm:$0xf] }
 0x1f3   :  { %v212_v28 = vrot.slane %v211_v26, 2  ;;  %v220_v29 = vadd.f32 %v219_v27, %v218_v25  ;;  %v696_v25 = vld [vmem:[#allocation2 + $0x8] sm:$0xf0]  ;;  %v694_v27 = vld [vmem:[#allocation2] sm:$0xf] }
 0x1f5   :  { %v213_v30 = vadd.f32 %v212_v28, %v211_v26  ;;  %v221_v31 = vrot.slane %v220_v29, 2  ;;  %v205_v32 = vpop.f32.mrf.mxu0  ;;  %v699_v26 = vor.u32 %v783_v24, %v696_v25  ;;  %v784_v28 = vld [vmem:[#allocation2 + $0x4] sm:$0xf0] }
 0x1f7   :  { %v214_v33 = vrot.slane %v213_v30, 1  ;;  %v222_v34 = vadd.f32 %v221_v31, %v220_v29  ;;  %366 = vmatpush.bf16.msrb.mxu1 %v699_v26 }
 0x1f9   :  { %v215_v35 = vadd.f32 %v214_v33, %v213_v30  ;;  %v223_v36 = vrot.slane %v222_v34, 1  ;;  %v695_v30 = vor.u32 %v784_v28, %v694_v27  ;;  %v730_v27 = vld [vmem:[#allocation2 + $0x60] sm:$0xf]  ;;  %v791_v28 = vld [vmem:[#allocation2 + $0x64] sm:$0xf0] }
 0x1fb   :  { %v216_v38 = vmul.f32 0.125, %v215_v35  ;;  %v224_v39 = vadd.f32 %v223_v36, %v222_v34 }
 0x1fd   :  { %v225_v41 = vmul.f32 0.125, %v224_v39  ;;  %v226_v42 = vmul.f32 %v216_v38, %v216_v38 }
 0x1ff   :  { %v227_v43 = vsub.f32 %v225_v41, %v226_v42  ;;  %v280_v42 = vld [vmem:[%s1007_s3 + $0x7] ss:$0 sm:$0xff] }
 0x201   :  { %v228_v44 = vmax.f32 %v227_v43, 0.0 }
 0x203   :  { %v229_v45 = vadd.f32 1e-05, %v228_v44 }
 0x205   :  { %811 = vrsqrt.f32 %v229_v45  ;;  %vm236_vm9 = vweird.f32 %v229_v45 }
 0x20b   :  { %v812_v46 = vpop.eup %811 }
 0x20c   :  { %v231_v47 = vmul.f32 %v812_v46, %v229_v45  ;;  %vm237_vm8 = vweird.f32 %v812_v46 }
 0x20d   :  { %vm238_vm10 = vmor %vm236_vm9, %vm237_vm8 }
 0x20e   :  { %v232_v48 = vmul.f32 %v812_v46, %v231_v47 }
 0x210   :  { %v233_v49 = vmul.f32 0.5, %v232_v48 }
 0x212   :  { %v234_v50 = vsub.f32 1.5, %v233_v49  ;;  %v742_v49 = vld [vmem:[#allocation2 + $0x90] sm:$0xf] }
 0x214   :  { %v235_v52 = vmul.f32 %v812_v46, %v234_v50  ;;  %v794_v50 = vld [vmem:[#allocation2 + $0x94] sm:$0xf0] }
 0x216   :  { %v239_v53 = vsel %vm238_vm10, %v812_v46, %v235_v52  ;;  %v802_v52 = vld [vmem:[#allocation2 + $0x114] sm:$0xf0] }
 0x217   :  { %v240_v54 = vmul.f32 %v239_v53, %v207_v51  ;;  %v774_v51 = vld [vmem:[#allocation2 + $0x110] sm:$0xf] }
 0x219   :  { %v241_v56 = vmul.f32 %v240_v54, %v216_v38  ;;  %v243_v57 = vmul.f32 %v240_v54, %v203_v21  ;;  %v703_v21 = vor.u32 %v786_v18, %v702_v17  ;;  %v279_v38 = vld [vmem:[%s1007_s3 + $0x3] ss:$0 sm:$0xff]  ;;  %v800_v18 = vld [vmem:[#allocation2 + $0xf4] sm:$0xf0] }
 0x21b   :  { %v242_v58 = vsub.f32 %v208_v55, %v241_v56  ;;  %352 = vmatpush.bf16.msra.mxu0 %v703_v21  ;;  %v743_v55 = vor.u32 %v794_v50, %v742_v49  ;;  %v775_v56 = vor.u32 %v802_v52, %v774_v51 }
 0x21d   :  { %v244_v59 = vadd.f32 %v243_v57, %v242_v58  ;;  %596 = vmatpush.bf16.msra.mxu2 %v743_v55  ;;  %609 = vmatpush.bf16.msrb.mxu3 %v775_v56  ;;  %v722_v55 = vld [vmem:[#allocation2 + $0x40] sm:$0xf]  ;;  %v789_v56 = vld [vmem:[#allocation2 + $0x44] sm:$0xf0] }
 0x21f   :  { %v245_v60 = vmax.f32 %v244_v59, 0.0  ;;  %353 = vmatpush.bf16.msra.mxu0 %v695_v30 }
 0x221   :  { %v250_v61 = vpack.c.bf16 %v245_v60, %v245_v60 }
 0x223   :  { %691 = vmatmul.msk.bf16.vlgmr.msra.gmra.mxu3 %vm64_vm1, %v250_v61  ;;  %v738_v61 = vld [vmem:[#allocation2 + $0x80] sm:$0xf] }
 0x2a6   :  { %v275_v62 = vpop.f32.mrf.mxu3 }
 0x2a7   :  { %v281_v63 = vsel %vm64_vm1, %v275_v62, 0.0  ;;  %v289_v0 = vmul.f32 %v275_v62, %v275_v62 }
 0x2a8   :  { %v282_v1 = vrot.slane %v281_v63, 4 }
 0x2a9   :  { %v290_v2 = vsel %vm64_vm1, %v289_v0, 0.0 }
 0x2aa   :  { %v283_v3 = vadd.f32 %v282_v1, %v281_v63  ;;  %v291_v4 = vrot.slane %v290_v2, 4  ;;  %v770_v63 = vld [vmem:[#allocation2 + $0x100] sm:$0xf] }
 0x2ac   :  { %v284_v5 = vrot.slane %v283_v3, 2  ;;  %v292_v6 = vadd.f32 %v291_v4, %v290_v2  ;;  %v801_v4 = vld [vmem:[#allocation2 + $0x104] sm:$0xf0] }
 0x2ae   :  { %v285_v7 = vadd.f32 %v284_v5, %v283_v3  ;;  %v293_v8 = vrot.slane %v292_v6, 2  ;;  %v277_v9 = vpop.f32.mrf.mxu3 }
 0x2b0   :  { %v286_v10 = vrot.slane %v285_v7, 1  ;;  %v294_v11 = vadd.f32 %v293_v8, %v292_v6  ;;  %v771_v6 = vor.u32 %v801_v4, %v770_v63 }
 0x2b2   :  { %v287_v12 = vadd.f32 %v286_v10, %v285_v7  ;;  %v295_v13 = vrot.slane %v294_v11, 1  ;;  %610 = vmatpush.bf16.msrb.mxu3 %v771_v6 }
 0x2b4   :  { %v288_v19 = vmul.f32 0.125, %v287_v12  ;;  %v296_v20 = vadd.f32 %v295_v13, %v294_v11  ;;  %v734_v11 = vld [vmem:[#allocation2 + $0x70] sm:$0xf]  ;;  %v792_v12 = vld [vmem:[#allocation2 + $0x74] sm:$0xf0] }
 0x2b5   :  { %v766_v13 = vld [vmem:[#allocation2 + $0xf0] sm:$0xf]  ;;  %v735_v21 = vor.u32 %v792_v12, %v734_v11 }
 0x2b6   :  { %v297_v22 = vmul.f32 0.125, %v296_v20  ;;  %v298_v23 = vmul.f32 %v288_v19, %v288_v19 }
 0x2b8   :  { %v299_v29 = vsub.f32 %v297_v22, %v298_v23  ;;  %v767_v22 = vor.u32 %v800_v18, %v766_v13 }
 0x2ba   :  { %v300_v31 = vmax.f32 %v299_v29, 0.0  ;;  %611 = vmatpush.bf16.msrb.mxu3 %v767_v22 }
 0x2bc   :  { %v301_v32 = vadd.f32 1e-05, %v300_v31 }
 0x2be   :  { %813 = vrsqrt.f32 %v301_v32  ;;  %vm308_vm12 = vweird.f32 %v301_v32 }
 0x2c4   :  { %v814_v33 = vpop.eup %813 }
 0x2c5   :  { %v303_v34 = vmul.f32 %v814_v33, %v301_v32  ;;  %vm309_vm11 = vweird.f32 %v814_v33 }
 0x2c6   :  { %vm310_vm13 = vmor %vm308_vm12, %vm309_vm11 }
 0x2c7   :  { %v304_v35 = vmul.f32 %v814_v33, %v303_v34  ;;  %v799_v34 = vld [vmem:[#allocation2 + $0xe4] sm:$0xf0] }
 0x2c9   :  { %v305_v36 = vmul.f32 0.5, %v304_v35  ;;  %v731_v35 = vor.u32 %v791_v28, %v730_v27 }
 0x2cb   :  { %v306_v37 = vsub.f32 1.5, %v305_v36 }
 0x2cd   :  { %v307_v39 = vmul.f32 %v814_v33, %v306_v37 }
 0x2cf   :  { %v311_v40 = vsel %vm310_vm13, %v814_v33, %v307_v39  ;;  %v762_v33 = vld [vmem:[#allocation2 + $0xe0] sm:$0xf] }
 0x2d0   :  { %v312_v41 = vmul.f32 %v311_v40, %v279_v38  ;;  %v763_v36 = vor.u32 %v799_v34, %v762_v33 }
 0x2d2   :  { %v313_v43 = vmul.f32 %v312_v41, %v288_v19  ;;  %v315_v45 = vmul.f32 %v312_v41, %v275_v62  ;;  %v793_v62 = vld [vmem:[#allocation2 + $0x84] sm:$0xf0]  ;;  %612 = vmatpush.bf16.msrb.mxu3 %v763_v36  ;;  %v726_v41 = vld [vmem:[#allocation2 + $0x50] sm:$0xf] }
 0x2d3   :  { %v739_v5 = vor.u32 %v793_v62, %v738_v61  ;;  %v797_v61 = vld [vmem:[#allocation2 + $0xc4] sm:$0xf0]  ;;  %v718_v62 = vld [vmem:[#allocation2 + $0x30] sm:$0xf] }
 0x2d4   :  { %v314_v44 = vsub.f32 %v280_v42, %v313_v43  ;;  %v790_v42 = vld [vmem:[#allocation2 + $0x54] sm:$0xf0]  ;;  %v758_v43 = vld [vmem:[#allocation2 + $0xd0] sm:$0xf] }
 0x2d5   :  { %597 = vmatpush.bf16.msra.mxu2 %v739_v5  ;;  %v727_v49 = vor.u32 %v790_v42, %v726_v41 }
 0x2d6   :  { %v316_v46 = vadd.f32 %v315_v45, %v314_v44 }
 0x2d8   :  { %v317_v47 = vmax.f32 %v316_v46, 0.0 }
 0x2d9   :  { %598 = vmatpush.bf16.msra.mxu2 %v735_v21 }
 0x2da   :  { %v318_v48 = vpack.c.bf16 %v317_v47, %v317_v47 }
 0x2dc   :  { %708 = vmatmul.msk.bf16.vlgmr.msra.gmra.mxu0 %vm64_vm1, %v318_v48  ;;  %709 = vmatmul.msk.bf16.vlgmr.msrb.gmra.mxu1 %vm64_vm1, %v318_v48  ;;  %v798_v48 = vld [vmem:[#allocation2 + $0xd4] sm:$0xf0] }
 0x2dd   :  { %599 = vmatpush.bf16.msra.mxu2 %v731_v35  ;;  %v759_v50 = vor.u32 %v798_v48, %v758_v43  ;;  %v711_v35 = vld [vmem:[%s1007_s3 + $0x11] ss:$8 sm:$0x3] }
 0x2df   :  { %613 = vmatpush.bf16.msrb.mxu3 %v759_v50 }
 0x2e1   :  { %600 = vmatpush.bf16.msra.mxu2 %v727_v49 }
 0x359   :  { %v968_v53 = vpop.f32.mrf.mxu0  ;;  %v970_v54 = vpop.f32.mrf.mxu1 }
 0x35a   :  { %v376_v57 = vrot.slane %v968_v53, 4  ;;  %v390_v58 = vmul.f32 %v968_v53, %v968_v53  ;;  %v382_v59 = vrot.slane %v970_v54, 4  ;;  %v391_v60 = vmul.f32 %v970_v54, %v970_v54 }
 0x35c   :  { %v377_v0 = vadd.f32 %v376_v57, %v968_v53  ;;  %v392_v1 = vrot.slane %v390_v58, 4  ;;  %v383_v2 = vadd.f32 %v382_v59, %v970_v54  ;;  %v398_v3 = vrot.slane %v391_v60, 4  ;;  %v754_v57 = vld [vmem:[#allocation2 + $0xc0] sm:$0xf] }
 0x35d   :  { %v755_v63 = vor.u32 %v797_v61, %v754_v57 }
 0x35e   :  { %v378_v7 = vrot.slane %v377_v0, 2  ;;  %v393_v8 = vadd.f32 %v392_v1, %v390_v58  ;;  %v384_v9 = vrot.slane %v383_v2, 2  ;;  %v399_v10 = vadd.f32 %v398_v3, %v391_v60  ;;  %v750_v1 = vld [vmem:[#allocation2 + $0xb0] sm:$0xf] }
 0x35f   :  { %v723_v60 = vor.u32 %v789_v56, %v722_v55  ;;  %614 = vmatpush.bf16.msrb.mxu3 %v755_v63 }
 0x360   :  { %v379_v14 = vadd.f32 %v378_v7, %v377_v0  ;;  %v394_v15 = vrot.slane %v393_v8, 2  ;;  %v385_v16 = vadd.f32 %v384_v9, %v383_v2  ;;  %v400_v17 = vrot.slane %v399_v10, 2  ;;  %v788_v0 = vld [vmem:[#allocation2 + $0x34] sm:$0xf0]  ;;  %v714_v7 = vld [vmem:[#allocation2 + $0x20] sm:$0xf] }
 0x361   :  { %v357_v19 = vpop.f32.mrf.mxu0  ;;  %v370_v20 = vpop.f32.mrf.mxu1  ;;  %v796_v2 = vld [vmem:[#allocation2 + $0xb4] sm:$0xf0]  ;;  %601 = vmatpush.bf16.msra.mxu2 %v723_v60  ;;  %v719_v5 = vor.u32 %v788_v0, %v718_v62  ;;  %v746_v9 = vld [vmem:[#allocation2 + $0xa0] sm:$0xf] }
 0x362   :  { %v380_v23 = vrot.slane %v379_v14, 1  ;;  %v395_v24 = vadd.f32 %v394_v15, %v393_v8  ;;  %v386_v25 = vrot.slane %v385_v16, 1  ;;  %v401_v26 = vadd.f32 %v400_v17, %v399_v10  ;;  %v787_v8 = vld [vmem:[#allocation2 + $0x24] sm:$0xf0] }
 0x363   :  { %v751_v6 = vor.u32 %v796_v2, %v750_v1  ;;  %v795_v10 = vld [vmem:[#allocation2 + $0xa4] sm:$0xf0]  ;;  %v715_v11 = vor.u32 %v787_v8, %v714_v7 }
 0x364   :  { %v381_v29 = vadd.f32 %v380_v23, %v379_v14  ;;  %v396_v30 = vrot.slane %v395_v24, 1  ;;  %v387_v31 = vadd.f32 %v386_v25, %v385_v16  ;;  %v402_v32 = vrot.slane %v401_v26, 1 }
 0x365   :  { %602 = vmatpush.bf16.msra.mxu2 %v719_v5  ;;  %615 = vmatpush.bf16.msrb.mxu3 %v751_v6  ;;  %v747_v12 = vor.u32 %v795_v10, %v746_v9 }
 0x366   :  { %v980_v37 = vmul.f32 0.125, %v381_v29  ;;  %v397_v38 = vadd.f32 %v396_v30, %v395_v24  ;;  %v982_v39 = vmul.f32 0.125, %v387_v31  ;;  %v403_v40 = vadd.f32 %v402_v32, %v401_v26  ;;  %v710_v26 = vld [vmem:[%s1007_s3 + $0x10] ss:$8 sm:$0x3] }
 0x368   :  { %v404_v44 = vmul.f32 0.125, %v397_v38  ;;  %v406_v45 = vmul.f32 %v980_v37, %v980_v37  ;;  %v405_v46 = vmul.f32 0.125, %v403_v40  ;;  %v407_v47 = vmul.f32 %v982_v39, %v982_v39 }
 0x369   :  { %603 = vmatpush.bf16.msra.mxu2 %v715_v11  ;;  %616 = vmatpush.bf16.msrb.mxu3 %v747_v12 }
 0x36a   :  { %v408_v51 = vsub.f32 %v404_v44, %v406_v45  ;;  %v409_v52 = vsub.f32 %v405_v46, %v407_v47 }
 0x36c   :  { %v410_v58 = vmax.f32 %v408_v51, 0.0  ;;  %v411_v59 = vmax.f32 %v409_v52, 0.0 }
 0x36e   :  { %v412_v3 = vadd.f32 1e-05, %v410_v58  ;;  %v413_v4 = vadd.f32 1e-05, %v411_v59  ;;  %v636_v59 = vlaneseq }
 0x370   :  { %815 = vrsqrt.f32 %v412_v3  ;;  %vm430_vm0 = vweird.f32 %v413_v4  ;;  %vm420_vm2 = vweird.f32 %v412_v3  ;;  %v637_v62 = vand.u32 127, %v636_v59 }
 0x371   :  { %817 = vrsqrt.f32 %v413_v4 }
 0x372   :  { %vm638_vm5 = vcmp.ge.s32.totalorder %v637_v62, 8  ;;  %vm639_vm6 = vcmp.lt.s32.totalorder %v637_v62, 16 }
 0x373   :  { %vm640_vm8 = vmand %vm638_vm5, %vm639_vm6 }
 0x376   :  { %v816_v13 = vpop.eup %815 }
 0x377   :  { %v818_v14 = vpop.eup %817  ;;  %v415_v15 = vmul.f32 %v816_v13, %v412_v3  ;;  %vm421_vm15 = vweird.f32 %v816_v13 }
 0x378   :  { %v425_v16 = vmul.f32 %v818_v14, %v413_v4  ;;  %vm431_vm14 = vweird.f32 %v818_v14  ;;  %vm422_vm4 = vmor %vm420_vm2, %vm421_vm15 }
 0x379   :  { %v416_v17 = vmul.f32 %v816_v13, %v415_v15  ;;  %vm432_vm1 = vmor %vm430_vm0, %vm431_vm14 }
 0x37a   :  { %v426_v18 = vmul.f32 %v818_v14, %v425_v16 }
 0x37b   :  { %v417_v19 = vmul.f32 0.5, %v416_v17 }
 0x37c   :  { %v427_v20 = vmul.f32 0.5, %v426_v18 }
 0x37d   :  { %v418_v21 = vsub.f32 1.5, %v417_v19 }
 0x37e   :  { %v428_v22 = vsub.f32 1.5, %v427_v20 }
 0x37f   :  { %v419_v23 = vmul.f32 %v816_v13, %v418_v21 }
 0x380   :  { %v429_v24 = vmul.f32 %v818_v14, %v428_v22 }
 0x381   :  { %v423_v28 = vsel %vm422_vm4, %v816_v13, %v419_v23 }
 0x382   :  { %v433_v25 = vsel %vm432_vm1, %v818_v14, %v429_v24 }
 0x383   :  { %v436_v27 = vrot.slane %v433_v25, 7 }
 0x385   :  { %v438_v29 = vsel %vm437_vm3, %v423_v28, %v436_v27 }
 0x386   :  { %v440_v30 = vmul.f32 %v710_v26, %v438_v29 }
 0x388   :  { %v443_v31 = vperm.slane %v440_v30, 1  ;;  %v442_v32 = vperm.slane %v440_v30, 0 }
 0x38a   :  { %v447_v33 = vmul.f32 %v443_v31, %v982_v39  ;;  %v446_v36 = vmul.f32 %v442_v32, %v980_v37  ;;  %v455_v41 = vmul.f32 %v443_v31, %v970_v54  ;;  %v454_v42 = vmul.f32 %v442_v32, %v968_v53  ;;  %v499_v37 = vld [vmem:[%s1007_s3 + $0x12] ss:$0 sm:$0xff]  ;;  %s878_s3 = smov [#allocation5]  }
 0x38b   :  { %s648_s29 = sshll.u32 %s878_s3, 4  ;;  %s649_s29 = int_to_ptr.vmem [resolvable:$true] %s648_s29 }
 0x38c   :  { %v450_v34 = vrot.slane %v447_v33, 7 }
 0x38e   :  { %v451_v38 = vsel %vm437_vm3, %v446_v36, %v450_v34 }
 0x38f   :  { %v453_v40 = vsub.f32 %v711_v35, %v451_v38 }
 0x391   :  { %v457_v43 = vperm.slane %v453_v40, 0  ;;  %v458_v44 = vperm.slane %v453_v40, 1 }
 0x393   :  { %v461_v45 = vadd.f32 %v457_v43, %v454_v42  ;;  %v462_v46 = vadd.f32 %v458_v44, %v455_v41 }
 0x395   :  { %v463_v47 = vmax.f32 %v461_v45, 0.0  ;;  %v464_v48 = vmax.f32 %v462_v46, 0.0 }
 0x397   :  { %v465_v39 = vpack.c.bf16 %v463_v47, %v463_v47  ;;  %v466_v49 = vpack.c.bf16 %v464_v48, %v464_v48 }
 0x399   :  { %604 = vmatmul.bf16.vlgmr.msra.gmra.mxu2 %v465_v39  ;;  %617 = vmatmul.bf16.vlgmr.msrb.gmra.mxu3 %v466_v49 }
 0x41c   :  { %v605_v50 = vpop.f32.mrf.mxu2  ;;  %v618_v51 = vpop.f32.mrf.mxu3 }
 0x41d   :  { %v606_v52 = vadd.f32 %v605_v50, %v499_v37 }
 0x41f   :  { %v619_v54 = vadd.f32 %v618_v51, %v606_v52 }
 0x421   :  { %v623_v55 = vmin.f32 %v619_v54, 20.0  ;;  %vm622_vm9 = vcmp.gt.f32.partialorder %v619_v54, 20.0 }
 0x423   :  { %v624_v53 = vmul.f32 1.442695, %v623_v55 }
 0x424   :  { %v607_v56 = vpop.f32.mrf.mxu2  ;;  %v620_v57 = vpop.f32.mrf.mxu3 }
 0x425   :  { %819 = vpow2.f32 %v624_v53 }
 0x42b   :  { %v820_v58 = vpop.eup %819 }
 0x42c   :  { %v626_v60 = vadd.f32 1.0, %v820_v58  ;;  %v629_v61 = vmul.f32 -0.5, %v820_v58  ;;  %v632_v0 = vand.u32 2147483647, %v820_v58 }
 0x42e   :  { %821 = vlog2.f32 %v626_v60  ;;  %v630_v63 = vadd.f32 1.0, %v629_v61  ;;  %vm633_vm7 = vcmp.lt.f32.partialorder %v632_v0, 0.0004427343 }
 0x430   :  { %v631_v3 = vmul.f32 %v820_v58, %v630_v63 }
 0x434   :  { %v822_v1 = vpop.eup %821 }
 0x435   :  { %v628_v2 = vmul.f32 0.6931472, %v822_v1 }
 0x437   :  { %v634_v4 = vsel %vm633_vm7, %v631_v3, %v628_v2 }
 0x438   :  { %v635_v5 = vsel %vm622_vm9, %v619_v54, %v634_v4 }
 0x439   :  { %v641_v6 = vsel %vm640_vm8, %v635_v5, %v619_v54 }
 0x43a   :  { %642 = vst [vmem:[#allocation5] sm:$0xff] %v641_v6 }
 0x43b   :  { %653 = dma.vmem_to_hbm [thread:$0]  %s649_s29, 128, %s651_s6, [#allocation4]  }
 0x43c   :  { %873 = dma.done.wait [#allocation4], 128  }
 0x43d   :  { %874 = vsyncadd [#allocation4], 4294967168 }
 0x43e   :  { %658 = vsyncpa [#allocation3], 1 }
 0x43f   :  { %659 = vsyncpa [#allocation4], 1 }

</bundles_post_ra>
